<compile_context>
chip_gen: v7x
topology: tpu7x:2x2x1
jax: 0.10.0
libtpu: 0.0.40
codegen_flags: <defaults>
</compile_context>

<pallas_src>
import functools

import jax
import jax.numpy as jnp
from jax.experimental import pallas as pl
from jax.experimental.pallas import tpu as pltpu


# ----------------------------------------------------------------------------
# Kernels
# ----------------------------------------------------------------------------
def _mean_pool_kernel(mask_ref, emb_ref, out_ref, *, use_sqrt_len: bool):
    """Masked mean (or mean/sqrt(len)) pooling over the sequence axis.

    mask_ref: (Bt, S)       mask in its original dtype (nonzero = keep)
    emb_ref : (Bt, S, Td)   token embeddings tile
    out_ref : (Bt, Td)      pooled sentence embeddings tile
    """
    mask = mask_ref[...].astype(jnp.float32)                 # (Bt, S)
    emb = emb_ref[...].astype(jnp.float32)                   # (Bt, S, Td) f32 accum
    masked = emb * mask[:, :, None]
    sum_embeddings = jnp.sum(masked, axis=1)                 # (Bt, Td)
    sum_mask = jnp.sum(mask, axis=1, keepdims=True)          # (Bt, 1)
    sum_mask = jnp.maximum(sum_mask, 1e-9)                   # torch.clamp(min=1e-9)
    denom = jnp.sqrt(sum_mask) if use_sqrt_len else sum_mask
    inv = pl.reciprocal(denom, approx=False)                 # exact; keeps 1e-5 tol
    out_ref[...] = (sum_embeddings * inv).astype(out_ref.dtype)


def _max_pool_kernel(mask_ref, emb_ref, out_ref):
    """Masked max pooling over the sequence axis (native dtype, no upcast).

    Positions with mask == 0 are replaced with -1e9 before the max, mirroring
    `token_embeddings[input_mask_expanded == 0] = -1e9`.
    """
    keep = (mask_ref[...] != 0)[:, :, None]                  # (Bt, S, 1) bool
    emb = emb_ref[...]                                       # (Bt, S, Td) native dtype
    neg_big = jnp.asarray(-1000000000.0, dtype=emb.dtype)
    masked = jnp.where(keep, emb, neg_big)
    out_ref[...] = jnp.max(masked, axis=1).astype(out_ref.dtype)


# ----------------------------------------------------------------------------
# Tile selection + pallas_call wrapper
# ----------------------------------------------------------------------------
def _select_tiles(B, S, D, itemsize):
    """Pick (Bt, Td): sublane-aligned batch tile, lane-dense hidden tile,
    with the embedding block kept small enough that double-buffering fits the
    default scoped VMEM on every TPU generation (incl. v7x)."""
    bt = next((t for t in (16, 8) if B % t == 0), B)
    per_buf_budget = 8 * 1024 * 1024  # bytes; x2 (double-buffer) stays << 32 MiB
    td = D
    if D % 128 == 0:
        for t in (512, 384, 256, 128):
            if D % t == 0 and bt * S * t * itemsize <= per_buf_budget:
                td = t
                break
        else:
            td = 128 if D % 128 == 0 else D
    return bt, td


def _pooled_call(kernel_fn, token_embeddings, attention_mask):
    B, S, D = token_embeddings.shape
    bt, td = _select_tiles(B, S, D, token_embeddings.dtype.itemsize)
    grid = (B // bt, D // td)

    return pl.pallas_call(
        kernel_fn,
        out_shape=jax.ShapeDtypeStruct((B, D), token_embeddings.dtype),
        grid_spec=pltpu.PrefetchScalarGridSpec(
            num_scalar_prefetch=0,
            grid=grid,
            in_specs=[
                # mask tile: tiny, re-fetched per D tile
                pl.BlockSpec((bt, S), lambda b, d: (b, 0)),
                # embedding tile: batch x full seq x hidden tile
                pl.BlockSpec((bt, S, td), lambda b, d: (b, 0, d)),
            ],
            out_specs=pl.BlockSpec((bt, td), lambda b, d: (b, d)),
        ),
        compiler_params=pltpu.CompilerParams(
            dimension_semantics=("parallel", "parallel")),
    )(attention_mask, token_embeddings)


class Pooling:
    """JAX/Pallas port of the PyTorch `Pooling` module.

    `pooling` is one of: 'mean', 'max', 'cls', 'meansqrt'.
    """

    def __init__(self, pooling: str, word_embedding_dimension: int):
        self.word_embedding_dimension = word_embedding_dimension
        self.pooling_mode_cls_token = pooling == "cls"
        self.pooling_mode_mean_tokens = pooling == "mean"
        self.pooling_mode_max_tokens = pooling == "max"
        self.pooling_mode_mean_sqrt_len_tokens = pooling == "meansqrt"
        self.pooling_output_dimension = word_embedding_dimension

    def __call__(self, features):
        token_embeddings = features["token_embeddings"]   # (B, S, D)
        cls_token = features["cls_token_embeddings"]      # (B, D)
        attention_mask = features["attention_mask"]        # (B, S), any dtype

        if self.pooling_mode_cls_token:
            # Pure slice passthrough; no compute to put in a kernel.
            output_vector = cls_token
        elif self.pooling_mode_max_tokens:
            output_vector = _pooled_call(
                _max_pool_kernel, token_embeddings, attention_mask)
        else:  # mean or mean-sqrt-len
            use_sqrt = self.pooling_mode_mean_sqrt_len_tokens
            # TODO(synk): optional 'token_weights_sum' override of sum_mask is
            # not wired into the kernel (would need an extra (B,1) input).
            output_vector = _pooled_call(
                functools.partial(_mean_pool_kernel, use_sqrt_len=use_sqrt),
                token_embeddings, attention_mask)

        new_features = dict(features)
        new_features["sentence_embedding"] = output_vector
        return new_features

    def get_sentence_embedding_dimension(self):
        return self.pooling_output_dimension


# ----------------------------------------------------------------------------
# Reference (pure JAX) for verification
# ----------------------------------------------------------------------------
def _reference(mode, token_embeddings, cls_token, attention_mask):
    mask = attention_mask.astype(jnp.float32)[:, :, None]
    if mode == "cls":
        return cls_token
    if mode == "max":
        masked = jnp.where(mask == 0.0, -1000000000.0, token_embeddings)
        return jnp.max(masked, axis=1)
    sum_embeddings = jnp.sum(token_embeddings * mask, axis=1)
    sum_mask = jnp.clip(jnp.sum(mask, axis=1), 1e-9, None)
    if mode == "mean":
        return sum_embeddings / sum_mask
    return sum_embeddings / jnp.sqrt(sum_mask)


# ----------------------------------------------------------------------------
# Main
# ----------------------------------------------------------------------------
if __name__ == "__main__":
    B, S, D = 2, 8, 32
    key = jax.random.PRNGKey(0)
    k_emb, k_cls = jax.random.split(key)

    token_embeddings = jax.random.normal(k_emb, (B, S, D), dtype=jnp.float32)
    cls_token = jax.random.normal(k_cls, (B, D), dtype=jnp.float32)
    # Variable-length sequences: row 0 has 5 valid tokens, row 1 has 8.
    lengths = jnp.array([5, 8], dtype=jnp.int32)
    attention_mask = (jnp.arange(S)[None, :] < lengths[:, None]).astype(jnp.float32)

    features = {
        "token_embeddings": token_embeddings,
        "cls_token_embeddings": cls_token,
        "attention_mask": attention_mask,
    }

    ok = True
    for mode in ("mean", "max", "meansqrt", "cls"):
        module = Pooling(mode, word_embedding_dimension=D)
        out = module(dict(features))["sentence_embedding"]
        jax.block_until_ready(out)
        ref = _reference(mode, token_embeddings, cls_token, attention_mask)
        if out.shape != (B, D):
            ok = False
        if not jnp.allclose(out, ref, atol=1e-5, rtol=1e-5):
            ok = False

    if ok:
        print("KERNEL_OK")
</pallas_src>

<mosaic_0001>
module attributes {stable_mosaic.version = 11 : i64} {
  func.func @_mean_pool_kernel(%arg0: i32, %arg1: i32, %arg2: memref<2x8xf32, #tpu.memory_space<vmem>>, %arg3: memref<2x8x32xf32, #tpu.memory_space<vmem>>, %arg4: memref<2x32xf32, #tpu.memory_space<vmem>>) attributes {dimension_semantics = [#tpu.dimension_semantics<parallel>, #tpu.dimension_semantics<parallel>], iteration_bounds = array<i64: 1, 1>, scalar_prefetch = 0 : i64, scratch_operands = 0 : i64, tpu.core_type = #tpu.core_type<tc>, window_params = [{transform_indices = @transform_0, window_bounds = array<i64: 2, 8>}, {transform_indices = @transform_1, window_bounds = array<i64: 2, 8, 32>}, {transform_indices = @transform_2, window_bounds = array<i64: 2, 32>}]} {
    %c0 = arith.constant 0 : index
    %c0_0 = arith.constant 0 : index
    %0 = vector.load %arg2[%c0, %c0_0] : memref<2x8xf32, #tpu.memory_space<vmem>>, vector<2x8xf32>
    %c0_1 = arith.constant 0 : index
    %c0_2 = arith.constant 0 : index
    %c0_3 = arith.constant 0 : index
    %1 = vector.load %arg3[%c0_1, %c0_2, %c0_3] : memref<2x8x32xf32, #tpu.memory_space<vmem>>, vector<2x8x32xf32>
    %2 = vector.shape_cast %0 : vector<2x8xf32> to vector<2x8x1xf32>
    %3 = vector.broadcast %2 : vector<2x8x1xf32> to vector<2x8x32xf32>
    %4 = arith.mulf %1, %3 : vector<2x8x32xf32>
    %cst = arith.constant dense<0.000000e+00> : vector<2x32xf32>
    %5 = vector.multi_reduction <add>, %4, %cst [1] : vector<2x8x32xf32> to vector<2x32xf32>
    %cst_4 = arith.constant dense<0.000000e+00> : vector<2xf32>
    %6 = vector.multi_reduction <add>, %0, %cst_4 [1] : vector<2x8xf32> to vector<2xf32>
    %7 = vector.shape_cast %6 : vector<2xf32> to vector<2x1xf32>
    %cst_5 = arith.constant 9.99999971E-10 : f32
    %8 = vector.broadcast %cst_5 : f32 to vector<2x1xf32>
    %9 = arith.maximumf %7, %8 : vector<2x1xf32>
    %10 = tpu.reciprocal %9 : vector<2x1xf32> -> vector<2x1xf32>
    %11 = vector.broadcast %10 : vector<2x1xf32> to vector<2x32xf32>
    %12 = arith.mulf %5, %11 : vector<2x32xf32>
    %c0_6 = arith.constant 0 : index
    %c0_7 = arith.constant 0 : index
    %13 = vector.load %arg4[%c0_6, %c0_7] : memref<2x32xf32, #tpu.memory_space<vmem>>, vector<2x32xf32>
    tpu.vector_store %arg4[%c0_6, %c0_7], %12 {strides = array<i32>} : memref<2x32xf32, #tpu.memory_space<vmem>>, vector<2x32xf32>,
    return
  }
  func.func @transform_0(%arg0: i32, %arg1: i32) -> (i32, i32) {
    %c0_i32 = arith.constant 0 : i32
    %c0_i32_0 = arith.constant 0 : i32
    return %arg0, %c0_i32 : i32, i32
  }
  func.func @transform_1(%arg0: i32, %arg1: i32) -> (i32, i32, i32) {
    %c0_i32 = arith.constant 0 : i32
    %c0_i32_0 = arith.constant 0 : i32
    return %arg0, %c0_i32, %arg1 : i32, i32, i32
  }
  func.func @transform_2(%arg0: i32, %arg1: i32) -> (i32, i32) {
    %c0_i32 = arith.constant 0 : i32
    return %arg0, %arg1 : i32, i32
  }
}

</mosaic_0001>

<bundles_post_ra>
// kernel: tpu_custom_call.1
= control target key start
LH: loop header
LB: loop body
LE: loop exit
PB: predicated region body
PF: predicated region fallthrough
CT: control target
= control target key end

     0   :  { %7 = vsyncpa [#allocation3], 0  ;;  %s250_s0 = inlined_call_operand.hbm [shape: f32[2,8], index: 0, kind: input, shape index: {}]   ;;  %s251_s1 = inlined_call_operand.hbm [shape: f32[2,8,32], index: 1, kind: input, shape index: {}]   ;;  %s252_s2 = inlined_call_operand.hbm [shape: f32[2,32], index: 2, kind: output, shape index: {}]  }
   0x1   :  { %8 = vsyncpa [#allocation6], 0 }
   0x2   :  { %9 = vsyncpa [#allocation4], 0  ;;  %s187_s9 = smov [#allocation2]   ;;  %s188_s11 = smov [#allocation5]  }
   0x3   :  { %s16_s10 = sshll.u32 %s187_s9, 4  ;;  %s25_s12 = sshll.u32 %s188_s11, 4  ;;  %s17_s10 = int_to_ptr.vmem [resolvable:$true] %s16_s10  ;;  %s207_s12 = int_to_ptr.vmem [resolvable:$true] %s25_s12 }
   0x4   :  { %s115_s15 = scalar_lea.hbm %s250_s0, 32 }
   0x5   :  { %p116_p0 = scmp.ne.s32.totalorder %s250_s0, %s115_s15  ;;  %p119_p1 = scmp.lt.u32.totalorder %s115_s15, %s250_s0 }
   0x7   :  { %p121_p2 = pnand %p119_p1, %p116_p0 }
   0x9   :  { %124 = shalt.err (!%p121_p2)
}
   0xa   :  { %s125_s20 = scalar_lea.vmem %s17_s10, 32  ;;  %p130_p4 = scmp.lt.s32.totalorder %s17_s10, %s17_s10 }
   0xb   :  { %p126_p3 = scmp.ne.s32.totalorder %s17_s10, %s125_s20  ;;  %p131_p5 = scmp.lt.s32.totalorder %s125_s20, %s125_s20 }
   0xd   :  { %p132_p6 = por %p131_p5, %p130_p4 }
   0xf   :  { %p133_p7 = pnand %p132_p6, %p126_p3 }
  0x11   :  { %136 = shalt.err (!%p133_p7)
}
  0x12   :  { %19 = dma.hbm_to_vmem [thread:$0]  %s250_s0, 32, %s17_s10, [#allocation3]  }
  0x13   :  { %s137_s25 = scalar_lea.hbm %s251_s1, 256 }
  0x14   :  { %p138_p8 = scmp.ne.s32.totalorder %s251_s1, %s137_s25  ;;  %p141_p9 = scmp.lt.u32.totalorder %s137_s25, %s251_s1 }
  0x16   :  { %p143_p10 = pnand %p141_p9, %p138_p8 }
  0x18   :  { %146 = shalt.err (!%p143_p10)
}
  0x19   :  { %s147_s30 = scalar_lea.vmem %s207_s12, 256  ;;  %p152_p12 = scmp.lt.s32.totalorder %s207_s12, %s207_s12 }
  0x1a   :  { %p148_p11 = scmp.ne.s32.totalorder %s207_s12, %s147_s30  ;;  %p153_p13 = scmp.lt.s32.totalorder %s147_s30, %s147_s30 }
  0x1c   :  { %p154_p0 = por %p153_p13, %p152_p12 }
  0x1e   :  { %p155_p1 = pnand %p154_p0, %p148_p11 }
  0x20   :  { %158 = shalt.err (!%p155_p1)
}
  0x21   :  { %s189_s0 = smov 128   ;;  %s190_s3 = smov 8  }
  0x22   :  { %31 = dma.hbm_to_vmem [thread:$0]  %s251_s1, 256, %s207_s12, [#allocation6], %s189_s0, %s189_s0, %s190_s3  }
  0x23   :  { %181 = dma.done.wait [#allocation3], 32  }
  0x24   :  { %182 = vsyncadd [#allocation3], 4294967264 }
  0x25   :  { %183 = dma.done.wait [#allocation6], 256  }
  0x26   :  { %184 = vsyncadd [#allocation6], 4294967040  ;;  %v41_v0 = vlaneseq  ;;  %vm72_vm0 = vcmask 58368   ;;  %v38_v3 = vld [vmem:[#allocation2] sm:$0x3]  ;;  %v39_v8 = vld [vmem:[#allocation5] sm:$0xff] }
  0x27   :  { %v73_v4 = vsel %vm72_vm0, %v38_v3, 0.0  ;;  %vm57_vm1 = vcmask 261120   ;;  %v40_v16 = vld [vmem:[#allocation5 + $0x8] sm:$0xff]  ;;  %s191_s1 = smov [#allocation7]   ;;  %vm87_vm2 = vcmask 1041409   ;;  %vm90_vm3 = vcmask 254976  }
  0x28   :  { %v42_v1 = vshrl.u32 %v41_v0, 7  ;;  %74 = vadd.xlane.f32.xlu0 %v73_v4  ;;  %s98_s6 = sshll.u32 %s191_s1, 4  ;;  %s99_s6 = int_to_ptr.vmem [resolvable:$true] %s98_s6 }
  0x29   :  { %s159_s7 = scalar_lea.vmem %s99_s6, 32  ;;  %p164_p3 = scmp.lt.s32.totalorder %s99_s6, %s99_s6 }
  0x2a   :  { %v43_v2 = vsub.s32 0, %v42_v1  ;;  %v50_v6 = vsub.s32 1, %v42_v1  ;;  %p160_p2 = scmp.ne.s32.totalorder %s99_s6, %s159_s7  ;;  %p165_p4 = scmp.lt.s32.totalorder %s159_s7, %s159_s7 }
  0x2c   :  { %v44_v5 = vrot.slane %v38_v3, %v43_v2  ;;  %v51_v7 = vrot.slane %v38_v3, %v50_v6  ;;  %p166_p5 = por %p165_p4, %p164_p3 }
  0x2e   :  { %46 = vbcast.lane.b32.xlu1 %v44_v5, 256  ;;  %p167_p6 = pnand %p166_p5, %p160_p2 }
  0x3e   :  { %53 = vbcast.lane.b32.xlu0 %v51_v7, 256 }
  0xa0   :  { %v47_v9 = vpop.permute.xlu1 %46 }
  0xa1   :  { %v55_v10 = vmul.f32 %v47_v9, %v39_v8 }
  0xa3   :  { %v58_v11 = vsel %vm57_vm1, %v55_v10, 0.0 }
  0xa4   :  { %v59_v12 = vrot.slane %v58_v11, 4 }
  0xa6   :  { %v60_v15 = vadd.f32 %v59_v12, %v58_v11 }
  0xa8   :  { %v61_v19 = vrot.slane %v60_v15, 2 }
  0xaa   :  { %v62_v22 = vadd.f32 %v61_v19, %v60_v15 }
  0xac   :  { %v63_v25 = vrot.slane %v62_v22, 1 }
  0xae   :  { %v64_v29 = vadd.f32 %v63_v25, %v62_v22 }
  0xb5   :  { %v75_v13 = vpop.xlane.xlu0 %74 }
  0xb6   :  { %v76_v14 = vmax.f32 %v75_v13, 1e-09 }
  0xb8   :  { %113 = vrcp.f32 %v76_v14 }
  0xb9   :  { %v54_v17 = vpop.permute.xlu0 %53 }
  0xba   :  { %v56_v18 = vmul.f32 %v54_v17, %v40_v16 }
  0xbc   :  { %v65_v20 = vsel %vm57_vm1, %v56_v18, 0.0 }
  0xbd   :  { %v66_v21 = vrot.slane %v65_v20, 4 }
  0xbf   :  { %v67_v23 = vadd.f32 %v66_v21, %v65_v20 }
  0xc1   :  { %v68_v24 = vrot.slane %v67_v23, 2 }
  0xc2   :  { %v114_v27 = vpop.eup %113 }
  0xc3   :  { %v69_v26 = vadd.f32 %v68_v24, %v67_v23  ;;  %v79_v31 = vrot.slane %v114_v27, 1  ;;  %v82_v33 = vmul.f32 %v114_v27, %v64_v29 }
  0xc5   :  { %v70_v28 = vrot.slane %v69_v26, 1 }
  0xc7   :  { %v71_v30 = vadd.f32 %v70_v28, %v69_v26 }
  0xc9   :  { %v83_v32 = vmul.f32 %v79_v31, %v71_v30 }
  0xcb   :  { %v86_v34 = vrot.slane %v83_v32, 7 }
  0xcd   :  { %v88_v35 = vsel %vm87_vm2, %v86_v34, %v82_v33 }
  0xce   :  { %91 = vst.msk [vmem:[#allocation7] sm:$0x3] %vm90_vm3, %v88_v35 }
  0xcf   :  { %170 = shalt.err (!%p167_p6)
}
  0xd0   :  { %s171_s10 = scalar_lea.hbm %s252_s2, 32 }
  0xd1   :  { %p172_p7 = scmp.ne.s32.totalorder %s252_s2, %s171_s10  ;;  %p175_p8 = scmp.lt.u32.totalorder %s171_s10, %s252_s2 }
  0xd3   :  { %p177_p9 = pnand %p175_p8, %p172_p7 }
  0xd5   :  { %180 = shalt.err (!%p177_p9)
}
  0xd6   :  { %101 = dma.vmem_to_hbm [thread:$0]  %s99_s6, 32, %s252_s2, [#allocation4]  }
  0xd7   :  { %185 = dma.done.wait [#allocation4], 32  }
  0xd8   :  { %186 = vsyncadd [#allocation4], 4294967264 }
  0xd9   :  { %105 = vsyncpa [#allocation3], 1 }
  0xda   :  { %106 = vsyncpa [#allocation6], 1 }
  0xdb   :  { %107 = vsyncpa [#allocation4], 1 }

</bundles_post_ra>
